<compile_context>
chip_gen: v5e
topology: v5e:2x2
jax: 0.10.0
libtpu: 0.0.40
codegen_flags: <defaults>
</compile_context>

<pallas_src>
import numpy as np
import jax
import jax.numpy as jnp
from jax.experimental import pallas as pl
from jax.experimental.pallas import tpu as pltpu


def _pairwise_loss_kernel(s_pos_ref, g_pos_ref, s_neg_ref, g_neg_ref,
                          out_ref, sum_acc, cnt_acc):
    c = pl.program_id(1)

    @pl.when(c == 0)
    def _():
        sum_acc[...] = jnp.zeros_like(sum_acc)
        cnt_acc[...] = jnp.zeros_like(cnt_acc)

    # (TR, 1) vs (1, TC) broadcast -> (TR, TC) on the VPU.
    mask = (g_pos_ref[...] == g_neg_ref[...]).astype(jnp.float32)   # 1 cmp + cast
    hinge = jnp.maximum(s_neg_ref[...] - s_pos_ref[...], 0.0)       # (s_neg+1) - s_pos
    # Lane reductions (axis=-1) go to the XLU and overlap the VPU work.
    sum_acc[...] += jnp.sum(mask * hinge, axis=-1, keepdims=True)
    cnt_acc[...] += jnp.sum(mask, axis=-1, keepdims=True)

    @pl.when(c == pl.num_programs(1) - 1)
    def _():
        out_ref[0:1, :] = jnp.full((1, 128), jnp.sum(sum_acc[...]), jnp.float32)
        out_ref[1:2, :] = jnp.full((1, 128), jnp.sum(cnt_acc[...]), jnp.float32)


def _pick_tile(npad, candidates):
    for cand in candidates:
        if npad % cand == 0:
            return cand
    return 128


def pairwise_loss(scores, labels, batch_num_nodes):
    """scores: f32[N], labels: {0,1}[N], batch_num_nodes: python list of ints."""
    scores = jnp.asarray(scores, jnp.float32)
    labels = jnp.asarray(labels, jnp.float32)
    n = int(scores.shape[0])
    assert sum(int(x) for x in batch_num_nodes) == n

    # Static (python-side) graph id per node -- glue, not compute.
    gids = jnp.asarray(
        np.repeat(np.arange(len(batch_num_nodes), dtype=np.float32),
                  np.asarray(batch_num_nodes, dtype=np.int64)))

    # Folded sentinels: pair (i, j) is valid iff g_pos[i] == g_neg[j].
    g_pos = jnp.where(labels == 1.0, gids, -1.0)
    g_neg = jnp.where(labels == 0.0, gids, -2.0)
    s_neg_p1 = scores + 1.0                  # fold the hinge's "+1" (O(N) wrapper work)

    npad = max(128, ((n + 127) // 128) * 128)
    pad = npad - n
    s_pos_p = jnp.pad(scores, (0, pad))
    g_pos_p = jnp.pad(g_pos, (0, pad), constant_values=-1.0)   # padded rows never match
    s_neg_p = jnp.pad(s_neg_p1, (0, pad))
    g_neg_p = jnp.pad(g_neg, (0, pad), constant_values=-2.0)   # padded cols never match

    # Positive side along sublanes (column form), negative side along lanes.
    s_pos_col = s_pos_p.reshape(npad, 1)
    g_pos_col = g_pos_p.reshape(npad, 1)
    s_neg_row = s_neg_p.reshape(1, npad)
    g_neg_row = g_neg_p.reshape(1, npad)

    tr = _pick_tile(npad, (256, 128))        # vreg-sized row tiles
    tc = _pick_tile(npad, (512, 256, 128))   # lane chunks over the reduction axis
    n_r, n_c = npad // tr, npad // tc

    partials = pl.pallas_call(
        _pairwise_loss_kernel,
        out_shape=jax.ShapeDtypeStruct((n_r, 2, 128), jnp.float32),
        grid=(n_r, n_c),
        in_specs=[
            pl.BlockSpec((tr, 1), lambda r, c: (r, 0)),
            pl.BlockSpec((tr, 1), lambda r, c: (r, 0)),
            pl.BlockSpec((1, tc), lambda r, c: (0, c)),
            pl.BlockSpec((1, tc), lambda r, c: (0, c)),
        ],
        out_specs=pl.BlockSpec((None, 2, 128), lambda r, c: (r, 0, 0)),
        scratch_shapes=[pltpu.VMEM((tr, 1), jnp.float32),
                        pltpu.VMEM((tr, 1), jnp.float32)],
        compiler_params=pltpu.CompilerParams(
            dimension_semantics=("parallel", "arbitrary")),
    )(s_pos_col, g_pos_col, s_neg_row, g_neg_row)

    total_sum = jnp.sum(partials[:, 0, 0])
    total_cnt = jnp.sum(partials[:, 1, 0])
    # No valid pairs anywhere => reference returns mean(scores * 0) == 0.
    return jnp.where(total_cnt > 0.0, total_sum / total_cnt, 0.0)


def _reference_numpy(scores, labels, batch_num_nodes):
    scores = np.asarray(scores, np.float64)
    labels = np.asarray(labels, np.int64)
    pairs = []
    off = 0
    for ns in batch_num_nodes:
        s = scores[off:off + ns]
        l = labels[off:off + ns]
        pos = np.nonzero(l)[0]
        neg = np.nonzero(1 - l)[0]
        for p in pos:
            for q in neg:
                pairs.append(s[p] - s[q])
        off += ns
    if len(pairs) == 0:
        return 0.0
    pairs = np.asarray(pairs)
    return float(np.mean(np.clip(1.0 - pairs, 0.0, None)))


if __name__ == "__main__":
    key = jax.random.PRNGKey(0)
    batch_num_nodes = [6, 5, 5]            # 3 graphs, 16 event nodes total
    n = sum(batch_num_nodes)

    k1, k2 = jax.random.split(key)
    scores = jax.random.normal(k1, (n,), dtype=jnp.float32)
    labels = (jax.random.uniform(k2, (n,)) > 0.5).astype(jnp.float32)

    loss = pairwise_loss(scores, labels, batch_num_nodes)
    loss = jax.block_until_ready(loss)

    ref = _reference_numpy(np.asarray(scores), np.asarray(labels), batch_num_nodes)
    assert abs(float(loss) - ref) < 1e-5, (float(loss), ref)
    print("KERNEL_OK")
</pallas_src>

<mosaic_0001>
module attributes {stable_mosaic.version = 11 : i64} {
  func.func @_pairwise_loss_kernel(%arg0: i32, %arg1: i32, %arg2: memref<128x1xf32, #tpu.memory_space<vmem>>, %arg3: memref<128x1xf32, #tpu.memory_space<vmem>>, %arg4: memref<1x128xf32, #tpu.memory_space<vmem>>, %arg5: memref<1x128xf32, #tpu.memory_space<vmem>>, %arg6: memref<1x2x128xf32, #tpu.memory_space<vmem>>, %arg7: memref<128x1xf32, #tpu.memory_space<vmem>>, %arg8: memref<128x1xf32, #tpu.memory_space<vmem>>) attributes {dimension_semantics = [#tpu.dimension_semantics<parallel>, #tpu.dimension_semantics<arbitrary>], iteration_bounds = array<i64: 1, 1>, scalar_prefetch = 0 : i64, scratch_operands = 2 : i64, tpu.core_type = #tpu.core_type<tc>, window_params = [{transform_indices = @transform_0, window_bounds = array<i64: 128, 1>}, {transform_indices = @transform_1, window_bounds = array<i64: 128, 1>}, {transform_indices = @transform_2, window_bounds = array<i64: 1, 128>}, {transform_indices = @transform_3, window_bounds = array<i64: 1, 128>}, {transform_indices = @transform_4, window_bounds = array<i64: 1, 2, 128>}]} {
    %c0_i32 = arith.constant 0 : i32
    %0 = arith.cmpi eq, %arg1, %c0_i32 : i32
    %1 = arith.extui %0 : i1 to i32
    %c0_i32_0 = arith.constant 0 : i32
    %2 = arith.cmpi ne, %1, %c0_i32_0 : i32
    scf.if %2 {
      %cst_20 = arith.constant 0.000000e+00 : f32
      %31 = vector.broadcast %cst_20 : f32 to vector<128x1xf32>
      %c0_21 = arith.constant 0 : index
      %c0_22 = arith.constant 0 : index
      %32 = vector.load %arg7[%c0_21, %c0_22] : memref<128x1xf32, #tpu.memory_space<vmem>>, vector<128x1xf32>
      tpu.vector_store %arg7[%c0_21, %c0_22], %31 {strides = array<i32>} : memref<128x1xf32, #tpu.memory_space<vmem>>, vector<128x1xf32>,
      %cst_23 = arith.constant 0.000000e+00 : f32
      %33 = vector.broadcast %cst_23 : f32 to vector<128x1xf32>
      %c0_24 = arith.constant 0 : index
      %c0_25 = arith.constant 0 : index
      %34 = vector.load %arg8[%c0_24, %c0_25] : memref<128x1xf32, #tpu.memory_space<vmem>>, vector<128x1xf32>
      tpu.vector_store %arg8[%c0_24, %c0_25], %33 {strides = array<i32>} : memref<128x1xf32, #tpu.memory_space<vmem>>, vector<128x1xf32>,
    } else {
    }
    %c0 = arith.constant 0 : index
    %c0_1 = arith.constant 0 : index
    %3 = vector.load %arg3[%c0, %c0_1] : memref<128x1xf32, #tpu.memory_space<vmem>>, vector<128x1xf32>
    %c0_2 = arith.constant 0 : index
    %c0_3 = arith.constant 0 : index
    %4 = vector.load %arg5[%c0_2, %c0_3] : memref<1x128xf32, #tpu.memory_space<vmem>>, vector<1x128xf32>
    %5 = vector.broadcast %3 : vector<128x1xf32> to vector<128x128xf32>
    %6 = vector.broadcast %4 : vector<1x128xf32> to vector<128x128xf32>
    %7 = arith.cmpf oeq, %5, %6 : vector<128x128xf32>
    %8 = arith.extui %7 : vector<128x128xi1> to vector<128x128xi32>
    %9 = arith.sitofp %8 : vector<128x128xi32> to vector<128x128xf32>
    %c0_4 = arith.constant 0 : index
    %c0_5 = arith.constant 0 : index
    %10 = vector.load %arg4[%c0_4, %c0_5] : memref<1x128xf32, #tpu.memory_space<vmem>>, vector<1x128xf32>
    %c0_6 = arith.constant 0 : index
    %c0_7 = arith.constant 0 : index
    %11 = vector.load %arg2[%c0_6, %c0_7] : memref<128x1xf32, #tpu.memory_space<vmem>>, vector<128x1xf32>
    %12 = vector.broadcast %10 : vector<1x128xf32> to vector<128x128xf32>
    %13 = vector.broadcast %11 : vector<128x1xf32> to vector<128x128xf32>
    %14 = arith.subf %12, %13 : vector<128x128xf32>
    %cst = arith.constant 0.000000e+00 : f32
    %15 = vector.broadcast %cst : f32 to vector<128x128xf32>
    %16 = arith.maximumf %14, %15 : vector<128x128xf32>
    %c0_8 = arith.constant 0 : index
    %c0_9 = arith.constant 0 : index
    %17 = vector.load %arg7[%c0_8, %c0_9] : memref<128x1xf32, #tpu.memory_space<vmem>>, vector<128x1xf32>
    %18 = arith.mulf %9, %16 : vector<128x128xf32>
    %cst_10 = arith.constant dense<0.000000e+00> : vector<128xf32>
    %19 = vector.multi_reduction <add>, %18, %cst_10 [1] : vector<128x128xf32> to vector<128xf32>
    %20 = vector.shape_cast %19 : vector<128xf32> to vector<128x1xf32>
    %21 = arith.addf %17, %20 : vector<128x1xf32>
    %c0_11 = arith.constant 0 : index
    %c0_12 = arith.constant 0 : index
    %22 = vector.load %arg7[%c0_11, %c0_12] : memref<128x1xf32, #tpu.memory_space<vmem>>, vector<128x1xf32>
    tpu.vector_store %arg7[%c0_11, %c0_12], %21 {strides = array<i32>} : memref<128x1xf32, #tpu.memory_space<vmem>>, vector<128x1xf32>,
    %c0_13 = arith.constant 0 : index
    %c0_14 = arith.constant 0 : index
    %23 = vector.load %arg8[%c0_13, %c0_14] : memref<128x1xf32, #tpu.memory_space<vmem>>, vector<128x1xf32>
    %cst_15 = arith.constant dense<0.000000e+00> : vector<128xf32>
    %24 = vector.multi_reduction <add>, %9, %cst_15 [1] : vector<128x128xf32> to vector<128xf32>
    %25 = vector.shape_cast %24 : vector<128xf32> to vector<128x1xf32>
    %26 = arith.addf %23, %25 : vector<128x1xf32>
    %c0_16 = arith.constant 0 : index
    %c0_17 = arith.constant 0 : index
    %27 = vector.load %arg8[%c0_16, %c0_17] : memref<128x1xf32, #tpu.memory_space<vmem>>, vector<128x1xf32>
    tpu.vector_store %arg8[%c0_16, %c0_17], %26 {strides = array<i32>} : memref<128x1xf32, #tpu.memory_space<vmem>>, vector<128x1xf32>,
    %c0_i32_18 = arith.constant 0 : i32
    %28 = arith.cmpi eq, %arg1, %c0_i32_18 : i32
    %29 = arith.extui %28 : i1 to i32
    %c0_i32_19 = arith.constant 0 : i32
    %30 = arith.cmpi ne, %29, %c0_i32_19 : i32
    scf.if %30 {
      %c0_20 = arith.constant 0 : index
      %c0_21 = arith.constant 0 : index
      %31 = vector.load %arg7[%c0_20, %c0_21] : memref<128x1xf32, #tpu.memory_space<vmem>>, vector<128x1xf32>
      %32 = vector.shape_cast %31 : vector<128x1xf32> to vector<1x128x1xf32>
      %cst_22 = arith.constant dense<0.000000e+00> : vector<1xf32>
      %33 = vector.multi_reduction <add>, %32, %cst_22 [1, 2] : vector<1x128x1xf32> to vector<1xf32>
      %34 = vector.shape_cast %33 : vector<1xf32> to vector<1x1x1xf32>
      %35 = vector.extract %34[0, 0, 0] : f32 from vector<1x1x1xf32>
      %36 = vector.broadcast %35 : f32 to vector<1x128xf32>
      %c0_23 = arith.constant 0 : index
      %c0_24 = arith.constant 0 : index
      %c0_25 = arith.constant 0 : index
      %37 = vector.load %arg6[%c0_23, %c0_24, %c0_25] : memref<1x2x128xf32, #tpu.memory_space<vmem>>, vector<1x1x128xf32>
      %38 = vector.shape_cast %37 : vector<1x1x128xf32> to vector<1x128xf32>
      %39 = vector.shape_cast %36 : vector<1x128xf32> to vector<1x1x128xf32>
      tpu.vector_store %arg6[%c0_23, %c0_24, %c0_25], %39 {strides = array<i32>} : memref<1x2x128xf32, #tpu.memory_space<vmem>>, vector<1x1x128xf32>,
      %c0_26 = arith.constant 0 : index
      %c0_27 = arith.constant 0 : index
      %40 = vector.load %arg8[%c0_26, %c0_27] : memref<128x1xf32, #tpu.memory_space<vmem>>, vector<128x1xf32>
      %41 = vector.shape_cast %40 : vector<128x1xf32> to vector<1x128x1xf32>
      %cst_28 = arith.constant dense<0.000000e+00> : vector<1xf32>
      %42 = vector.multi_reduction <add>, %41, %cst_28 [1, 2] : vector<1x128x1xf32> to vector<1xf32>
      %43 = vector.shape_cast %42 : vector<1xf32> to vector<1x1x1xf32>
      %44 = vector.extract %43[0, 0, 0] : f32 from vector<1x1x1xf32>
      %45 = vector.broadcast %44 : f32 to vector<1x128xf32>
      %c0_29 = arith.constant 0 : index
      %c1 = arith.constant 1 : index
      %c0_30 = arith.constant 0 : index
      %46 = vector.load %arg6[%c0_29, %c1, %c0_30] : memref<1x2x128xf32, #tpu.memory_space<vmem>>, vector<1x1x128xf32>
      %47 = vector.shape_cast %46 : vector<1x1x128xf32> to vector<1x128xf32>
      %48 = vector.shape_cast %45 : vector<1x128xf32> to vector<1x1x128xf32>
      tpu.vector_store %arg6[%c0_29, %c1, %c0_30], %48 {strides = array<i32>} : memref<1x2x128xf32, #tpu.memory_space<vmem>>, vector<1x1x128xf32>,
    } else {
    }
    return
  }
  func.func @transform_0(%arg0: i32, %arg1: i32) -> (i32, i32) {
    %c0_i32 = arith.constant 0 : i32
    %c0_i32_0 = arith.constant 0 : i32
    return %arg0, %c0_i32 : i32, i32
  }
  func.func @transform_1(%arg0: i32, %arg1: i32) -> (i32, i32) {
    %c0_i32 = arith.constant 0 : i32
    %c0_i32_0 = arith.constant 0 : i32
    return %arg0, %c0_i32 : i32, i32
  }
  func.func @transform_2(%arg0: i32, %arg1: i32) -> (i32, i32) {
    %c0_i32 = arith.constant 0 : i32
    %c0_i32_0 = arith.constant 0 : i32
    return %c0_i32, %arg1 : i32, i32
  }
  func.func @transform_3(%arg0: i32, %arg1: i32) -> (i32, i32) {
    %c0_i32 = arith.constant 0 : i32
    %c0_i32_0 = arith.constant 0 : i32
    return %c0_i32, %arg1 : i32, i32
  }
  func.func @transform_4(%arg0: i32, %arg1: i32) -> (i32, i32, i32) {
    %c0_i32 = arith.constant 0 : i32
    %c0_i32_0 = arith.constant 0 : i32
    %c0_i32_1 = arith.constant 0 : i32
    return %arg0, %c0_i32, %c0_i32_0 : i32, i32, i32
  }
}

</mosaic_0001>

<bundles_post_ra>
// kernel: tpu_custom_call.1
= control target key start
LH: loop header
LB: loop body
LE: loop exit
PB: predicated region body
PF: predicated region fallthrough
CT: control target
= control target key end

     0   :  { %v701_v3 = vmov 0   ;;  %s1026_s0 = inlined_call_operand.vmem [shape: f32[128,1], index: 0, kind: input, shape index: {}]   ;;  %s1027_s1 = inlined_call_operand.vmem [shape: f32[128,1], index: 1, kind: input, shape index: {}]   ;;  %s1028_s2 = inlined_call_operand.vmem [shape: f32[1,128], index: 2, kind: input, shape index: {}]   ;;  %s1029_s3 = inlined_call_operand.vmem [shape: f32[1,128], index: 3, kind: input, shape index: {}]   ;;  %s1030_s4 = inlined_call_operand.hbm [shape: f32[1,2,128], index: 4, kind: output, shape index: {}]  }
   0x1   :  { %v59_v0 = vld [vmem:[%s1027_s1 + $0x20] sm:$0xff]  ;;  %v57_v1 = vld [vmem:[%s1027_s1 + $0x10] sm:$0xff]  ;;  %672 = vset.pattern.permute.xlu2 %v701_v3  ;;  %671 = vset.pattern.permute.xlu1 %v701_v3 }
   0x2   :  { %v55_v2 = vld [vmem:[%s1027_s1] sm:$0xff]  ;;  %670 = vset.pattern.permute.xlu0 %v701_v3  ;;  %94 = vperm.xlu2 %672, %v59_v0  }
   0x3   :  { %84 = vperm.xlu1 %671, %v57_v1   ;;  %74 = vperm.xlu0 %670, %v55_v2  }
   0x4   :  { %9 = vsyncpa [#allocation5], 0  ;;  %v60_v4 = vld [vmem:[%s1027_s1 + $0x28] sm:$0xff]  ;;  %v58_v5 = vld [vmem:[%s1027_s1 + $0x18] sm:$0xff]  ;;  %v702_v42 = vmov 0.0   ;;  %vm22_vm14 = vcmask 7168  }
   0x5   :  { %v56_v6 = vld [vmem:[%s1027_s1 + $0x8] sm:$0xff]  ;;  %v63_v7 = vld [vmem:[%s1027_s1 + $0x40] sm:$0xff]  ;;  %v62_v8 = vld [vmem:[%s1027_s1 + $0x38] sm:$0xff]  ;;  %39 = vst.msk [vmem:[#allocation3] sm:$0xff] %vm22_vm14, %v702_v42  ;;  %s638_s6 = sshll.u32 %s1030_s4, 4  ;;  %s639_s6 = int_to_ptr.hbm [resolvable:$true] %s638_s6 }
   0x6   :  { %v61_v9 = vld [vmem:[%s1027_s1 + $0x30] sm:$0xff]  ;;  %v66_v10 = vld [vmem:[%s1027_s1 + $0x58] sm:$0xff]  ;;  %v64_v12 = vld [vmem:[%s1027_s1 + $0x48] sm:$0xff]  ;;  %23 = vst.msk [vmem:[#allocation2] sm:$0xff] %vm22_vm14, %v702_v42 }
   0x7   :  { %v65_v11 = vld [vmem:[%s1027_s1 + $0x50] sm:$0xff]  ;;  %v205_v13 = vld [vmem:[%s1026_s0 + $0x8] sm:$0xff]  ;;  %v204_v14 = vld [vmem:[%s1026_s0] sm:$0xff]  ;;  %24 = vst.msk [vmem:[#allocation2 + $0x8] sm:$0xff] %vm22_vm14, %v702_v42 }
   0x8   :  { %v67_v15 = vld [vmem:[%s1027_s1 + $0x60] sm:$0xff]  ;;  %v207_v17 = vld [vmem:[%s1026_s0 + $0x18] sm:$0xff]  ;;  %v206_v18 = vld [vmem:[%s1026_s0 + $0x10] sm:$0xff]  ;;  %25 = vst.msk [vmem:[#allocation2 + $0x10] sm:$0xff] %vm22_vm14, %v702_v42 }
   0x9   :  { %v208_v16 = vld [vmem:[%s1026_s0 + $0x20] sm:$0xff]  ;;  %v211_v19 = vld [vmem:[%s1026_s0 + $0x38] sm:$0xff]  ;;  %v210_v20 = vld [vmem:[%s1026_s0 + $0x30] sm:$0xff]  ;;  %26 = vst.msk [vmem:[#allocation2 + $0x18] sm:$0xff] %vm22_vm14, %v702_v42 }
   0xa   :  { %99 = vperm.xlu2 %672, %v60_v4   ;;  %v209_v21 = vld [vmem:[%s1026_s0 + $0x28] sm:$0xff]  ;;  %v214_v22 = vld [vmem:[%s1026_s0 + $0x50] sm:$0xff]  ;;  %v212_v24 = vld [vmem:[%s1026_s0 + $0x40] sm:$0xff]  ;;  %27 = vst.msk [vmem:[#allocation2 + $0x20] sm:$0xff] %vm22_vm14, %v702_v42 }
   0xb   :  { %89 = vperm.xlu1 %671, %v58_v5   ;;  %79 = vperm.xlu0 %670, %v56_v6   ;;  %v213_v23 = vld [vmem:[%s1026_s0 + $0x48] sm:$0xff]  ;;  %v216_v26 = vld [vmem:[%s1026_s0 + $0x60] sm:$0xff]  ;;  %v215_v27 = vld [vmem:[%s1026_s0 + $0x58] sm:$0xff]  ;;  %28 = vst.msk [vmem:[#allocation2 + $0x28] sm:$0xff] %vm22_vm14, %v702_v42 }
   0xc   :  { %v217_v25 = vld [vmem:[%s1026_s0 + $0x68] sm:$0xff]  ;;  %v69_v28 = vld [vmem:[%s1027_s1 + $0x70] sm:$0xff]  ;;  %v70_v31 = vld [vmem:[%s1027_s1 + $0x78] sm:$0xff]  ;;  %29 = vst.msk [vmem:[#allocation2 + $0x30] sm:$0xff] %vm22_vm14, %v702_v42 }
   0xd   :  { %v218_v29 = vld [vmem:[%s1026_s0 + $0x70] sm:$0xff]  ;;  %v68_v30 = vld [vmem:[%s1027_s1 + $0x68] sm:$0xff]  ;;  %v219_v32 = vld [vmem:[%s1026_s0 + $0x78] sm:$0xff]  ;;  %30 = vst.msk [vmem:[#allocation2 + $0x38] sm:$0xff] %vm22_vm14, %v702_v42 }
   0xe   :  { %v832_v37 = vld [vmem:[%s1029_s3] ss:$0 sm:$0xff]  ;;  %31 = vst.msk [vmem:[#allocation2 + $0x40] sm:$0xff] %vm22_vm14, %v702_v42 }
   0xf   :  { %v838_v40 = vld [vmem:[%s1028_s2] ss:$0 sm:$0xff]  ;;  %32 = vst.msk [vmem:[#allocation2 + $0x48] sm:$0xff] %vm22_vm14, %v702_v42  ;;  %s703_s2 = smov [#allocation4]  }
  0x10   :  { %33 = vst.msk [vmem:[#allocation2 + $0x50] sm:$0xff] %vm22_vm14, %v702_v42  ;;  %s636_s3 = sshll.u32 %s703_s2, 4  ;;  %s637_s3 = int_to_ptr.vmem [resolvable:$true] %s636_s3 }
  0x11   :  { %34 = vst.msk [vmem:[#allocation2 + $0x58] sm:$0xff] %vm22_vm14, %v702_v42 }
  0x12   :  { %114 = vperm.xlu2 %672, %v63_v7   ;;  %35 = vst.msk [vmem:[#allocation2 + $0x60] sm:$0xff] %vm22_vm14, %v702_v42 }
  0x13   :  { %109 = vperm.xlu1 %671, %v62_v8   ;;  %104 = vperm.xlu0 %670, %v61_v9   ;;  %36 = vst.msk [vmem:[#allocation2 + $0x68] sm:$0xff] %vm22_vm14, %v702_v42 }
  0x14   :  { %37 = vst.msk [vmem:[#allocation2 + $0x70] sm:$0xff] %vm22_vm14, %v702_v42 }
  0x15   :  { %38 = vst.msk [vmem:[#allocation2 + $0x78] sm:$0xff] %vm22_vm14, %v702_v42 }
  0x16   :  { %40 = vst.msk [vmem:[#allocation3 + $0x8] sm:$0xff] %vm22_vm14, %v702_v42 }
  0x17   :  { %41 = vst.msk [vmem:[#allocation3 + $0x10] sm:$0xff] %vm22_vm14, %v702_v42 }
  0x18   :  { %42 = vst.msk [vmem:[#allocation3 + $0x18] sm:$0xff] %vm22_vm14, %v702_v42 }
  0x19   :  { %43 = vst.msk [vmem:[#allocation3 + $0x20] sm:$0xff] %vm22_vm14, %v702_v42 }
  0x1a   :  { %129 = vperm.xlu2 %672, %v66_v10   ;;  %44 = vst.msk [vmem:[#allocation3 + $0x28] sm:$0xff] %vm22_vm14, %v702_v42 }
  0x1b   :  { %124 = vperm.xlu1 %671, %v65_v11   ;;  %119 = vperm.xlu0 %670, %v64_v12   ;;  %45 = vst.msk [vmem:[#allocation3 + $0x30] sm:$0xff] %vm22_vm14, %v702_v42 }
  0x1c   :  { %46 = vst.msk [vmem:[#allocation3 + $0x38] sm:$0xff] %vm22_vm14, %v702_v42 }
  0x1d   :  { %47 = vst.msk [vmem:[#allocation3 + $0x40] sm:$0xff] %vm22_vm14, %v702_v42 }
  0x1e   :  { %48 = vst.msk [vmem:[#allocation3 + $0x48] sm:$0xff] %vm22_vm14, %v702_v42 }
  0x1f   :  { %49 = vst.msk [vmem:[#allocation3 + $0x50] sm:$0xff] %vm22_vm14, %v702_v42 }
  0x20   :  { %50 = vst.msk [vmem:[#allocation3 + $0x58] sm:$0xff] %vm22_vm14, %v702_v42 }
  0x21   :  { %51 = vst.msk [vmem:[#allocation3 + $0x60] sm:$0xff] %vm22_vm14, %v702_v42 }
  0x22   :  { %230 = vperm.xlu2 %672, %v205_v13   ;;  %52 = vst.msk [vmem:[#allocation3 + $0x68] sm:$0xff] %vm22_vm14, %v702_v42 }
  0x23   :  { %225 = vperm.xlu1 %671, %v204_v14   ;;  %134 = vperm.xlu0 %670, %v67_v15   ;;  %53 = vst.msk [vmem:[#allocation3 + $0x70] sm:$0xff] %vm22_vm14, %v702_v42 }
  0x24   :  { %54 = vst.msk [vmem:[#allocation3 + $0x78] sm:$0xff] %vm22_vm14, %v702_v42 }
  0x2a   :  { %245 = vperm.xlu2 %672, %v208_v16  }
  0x2b   :  { %240 = vperm.xlu1 %671, %v207_v17   ;;  %235 = vperm.xlu0 %670, %v206_v18  }
  0x32   :  { %260 = vperm.xlu2 %672, %v211_v19  }
  0x33   :  { %255 = vperm.xlu1 %671, %v210_v20   ;;  %250 = vperm.xlu0 %670, %v209_v21  }
  0x3a   :  { %275 = vperm.xlu2 %672, %v214_v22  }
  0x3b   :  { %270 = vperm.xlu1 %671, %v213_v23   ;;  %265 = vperm.xlu0 %670, %v212_v24  }
  0x42   :  { %290 = vperm.xlu2 %672, %v217_v25  }
  0x43   :  { %285 = vperm.xlu1 %671, %v216_v26   ;;  %280 = vperm.xlu0 %670, %v215_v27  }
  0x4a   :  { %144 = vperm.xlu2 %672, %v69_v28  }
  0x4b   :  { %295 = vperm.xlu1 %671, %v218_v29   ;;  %139 = vperm.xlu0 %670, %v68_v30  }
  0x53   :  { %149 = vperm.xlu1 %671, %v70_v31   ;;  %300 = vperm.xlu0 %670, %v219_v32  }
  0x5c   :  { %v95_v33 = vpop.permute.xlu2 %94 }
  0x5d   :  { %vm159_vm3 = vcmp.eq.f32.partialorder %v95_v33, %v832_v37 }
  0x5e   :  { %v651_v58 = vsel %vm159_vm3, 1.0, %v702_v42 }
  0x64   :  { %v100_v34 = vpop.permute.xlu2 %99 }
  0x65   :  { %vm160_vm4 = vcmp.eq.f32.partialorder %v100_v34, %v832_v37 }
  0x66   :  { %v652_v2 = vsel %vm160_vm4, 1.0, %v702_v42 }
  0x6c   :  { %v825_v35 = vpop.permute.xlu2 %114 }
  0x6d   :  { %vm163_vm7 = vcmp.eq.f32.partialorder %v825_v35, %v832_v37 }
  0x6e   :  { %v655_v22 = vsel %vm163_vm7, 1.0, %v702_v42 }
  0x74   :  { %v827_v36 = vpop.permute.xlu2 %129 }
  0x75   :  { %v85_v38 = vpop.permute.xlu1 %84  ;;  %v75_v39 = vpop.permute.xlu0 %74  ;;  %vm166_vm10 = vcmp.eq.f32.partialorder %v827_v36, %v832_v37 }
  0x76   :  { %vm155_vm0 = vcmp.eq.f32.partialorder %v75_v39, %v832_v37  ;;  %vm157_vm2 = vcmp.eq.f32.partialorder %v85_v38, %v832_v37  ;;  %v658_v39 = vsel %vm166_vm10, 1.0, %v702_v42 }
  0x77   :  { %v647_v43 = vsel %vm155_vm0, 1.0, %v702_v42  ;;  %v649_v54 = vsel %vm157_vm2, 1.0, %v702_v42 }
  0x7c   :  { %v231_v41 = vpop.permute.xlu2 %230 }
  0x7d   :  { %v304_v44 = vsub.f32 %v838_v40, %v231_v41  ;;  %v90_v45 = vpop.permute.xlu1 %89  ;;  %v80_v46 = vpop.permute.xlu0 %79  ;;  %448 = vadd.xlane.f32.xlu1 %v647_v43 }
  0x7e   :  { %vm156_vm1 = vcmp.eq.f32.partialorder %v80_v46, %v832_v37  ;;  %vm158_vm6 = vcmp.eq.f32.partialorder %v90_v45, %v832_v37 }
  0x7f   :  { %v320_v47 = vmax.f32 %v304_v44, 0.0  ;;  %v648_v48 = vsel %vm156_vm1, 1.0, %v702_v42  ;;  %v650_v12 = vsel %vm158_vm6, 1.0, %v702_v42 }
  0x80   :  { %450 = vadd.xlane.f32.xlu2 %v648_v48 }
  0x81   :  { %v352_v49 = vmul.f32 %v648_v48, %v320_v47 }
  0x83   :  { %369 = vadd.xlane.f32.xlu0 %v352_v49 }
  0x84   :  { %v246_v52 = vpop.permute.xlu2 %245 }
  0x85   :  { %v110_v50 = vpop.permute.xlu1 %109  ;;  %v105_v51 = vpop.permute.xlu0 %104  ;;  %v307_v53 = vsub.f32 %v838_v40, %v246_v52 }
  0x86   :  { %vm162_vm5 = vcmp.eq.f32.partialorder %v110_v50, %v832_v37  ;;  %vm161_vm9 = vcmp.eq.f32.partialorder %v105_v51, %v832_v37 }
  0x87   :  { %v323_v55 = vmax.f32 %v307_v53, 0.0  ;;  %v654_v9 = vsel %vm162_vm5, 1.0, %v702_v42  ;;  %v653_v28 = vsel %vm161_vm9, 1.0, %v702_v42 }
  0x89   :  { %v355_v59 = vmul.f32 %v651_v58, %v323_v55 }
  0x8b   :  { %452 = vadd.xlane.f32.xlu0 %v649_v54 }
  0x8c   :  { %v261_v62 = vpop.permute.xlu2 %260 }
  0x8d   :  { %v125_v56 = vpop.permute.xlu1 %124  ;;  %v848_v57 = vpop.permute.xlu0 %119  ;;  %v310_v1 = vsub.f32 %v838_v40, %v261_v62 }
  0x8e   :  { %vm165_vm8 = vcmp.eq.f32.partialorder %v125_v56, %v832_v37  ;;  %vm164_vm11 = vcmp.eq.f32.partialorder %v848_v57, %v832_v37 }
  0x8f   :  { %v326_v4 = vmax.f32 %v310_v1, 0.0  ;;  %v657_v27 = vsel %vm165_vm8, 1.0, %v702_v42  ;;  %v656_v47 = vsel %vm164_vm11, 1.0, %v702_v42 }
  0x91   :  { %v358_v13 = vmul.f32 %v654_v9, %v326_v4 }
  0x93   :  { %375 = vadd.xlane.f32.xlu0 %v355_v59 }
  0x94   :  { %v276_v17 = vpop.permute.xlu2 %275 }
  0x95   :  { %v226_v60 = vpop.permute.xlu1 %225  ;;  %v851_v61 = vpop.permute.xlu0 %134  ;;  %v313_v19 = vsub.f32 %v838_v40, %v276_v17 }
  0x96   :  { %v303_v63 = vsub.f32 %v838_v40, %v226_v60  ;;  %vm167_vm15 = vcmp.eq.f32.partialorder %v851_v61, %v832_v37 }
  0x97   :  { %v329_v23 = vmax.f32 %v313_v19, 0.0  ;;  %v437_v19 = vld [vmem:[#allocation3 + $0x28] sm:$0xff] }
  0x98   :  { %v319_v0 = vmax.f32 %v303_v63, 0.0 }
  0x99   :  { %v361_v29 = vmul.f32 %v657_v27, %v329_v23 }
  0x9a   :  { %v351_v3 = vmul.f32 %v647_v43, %v319_v0 }
  0x9b   :  { %458 = vadd.xlane.f32.xlu0 %v652_v2 }
  0x9c   :  { %367 = vadd.xlane.f32.xlu2 %v351_v3  ;;  %v291_v34 = vpop.permute.xlu2 %290 }
  0x9d   :  { %v241_v5 = vpop.permute.xlu1 %240  ;;  %v236_v6 = vpop.permute.xlu0 %235  ;;  %v316_v41 = vsub.f32 %v838_v40, %v291_v34  ;;  %v440_v34 = vld [vmem:[#allocation3 + $0x40] sm:$0xff] }
  0x9e   :  { %v306_v7 = vsub.f32 %v838_v40, %v241_v5  ;;  %v305_v8 = vsub.f32 %v838_v40, %v236_v6 }
  0x9f   :  { %v332_v36 = vmax.f32 %v316_v41, 0.0 }
  0xa0   :  { %v322_v10 = vmax.f32 %v306_v7, 0.0  ;;  %v321_v11 = vmax.f32 %v305_v8, 0.0  ;;  %v433_v8 = vld [vmem:[#allocation3 + $0x8] sm:$0xff] }
  0xa2   :  { %v354_v14 = vmul.f32 %v650_v12, %v322_v10  ;;  %v353_v15 = vmul.f32 %v649_v54, %v321_v11  ;;  %v336_v11 = vld [vmem:[#allocation2 + $0x8] sm:$0xff] }
  0xa3   :  { %381 = vadd.xlane.f32.xlu0 %v358_v13 }
  0xa4   :  { %373 = vadd.xlane.f32.xlu1 %v354_v14  ;;  %371 = vadd.xlane.f32.xlu2 %v353_v15  ;;  %v145_v51 = vpop.permute.xlu2 %144  ;;  %v434_v14 = vld [vmem:[#allocation3 + $0x10] sm:$0xff] }
  0xa5   :  { %v251_v16 = vpop.permute.xlu0 %250  ;;  %v256_v18 = vpop.permute.xlu1 %255  ;;  %vm169_vm13 = vcmp.eq.f32.partialorder %v145_v51, %v832_v37 }
  0xa6   :  { %v309_v20 = vsub.f32 %v838_v40, %v256_v18  ;;  %v308_v21 = vsub.f32 %v838_v40, %v251_v16  ;;  %v661_v55 = vsel %vm169_vm13, 1.0, %v702_v42 }
  0xa8   :  { %v325_v25 = vmax.f32 %v309_v20, 0.0  ;;  %v324_v26 = vmax.f32 %v308_v21, 0.0  ;;  %v335_v20 = vld [vmem:[#allocation2] sm:$0xff] }
  0xaa   :  { %v357_v30 = vmul.f32 %v653_v28, %v325_v25  ;;  %v356_v31 = vmul.f32 %v652_v2, %v324_v26  ;;  %v342_v25 = vld [vmem:[#allocation2 + $0x38] sm:$0xff] }
  0xab   :  { %464 = vadd.xlane.f32.xlu0 %v655_v22  ;;  %v338_v26 = vld [vmem:[#allocation2 + $0x18] sm:$0xff] }
  0xac   :  { %456 = vadd.xlane.f32.xlu1 %v651_v58  ;;  %454 = vadd.xlane.f32.xlu2 %v650_v12  ;;  %v659_v58 = vsel %vm167_vm15, 1.0, %v702_v42 }
  0xad   :  { %v266_v24 = vpop.permute.xlu0 %265  ;;  %v271_v33 = vpop.permute.xlu1 %270 }
  0xae   :  { %v312_v35 = vsub.f32 %v838_v40, %v271_v33  ;;  %v311_v38 = vsub.f32 %v838_v40, %v266_v24 }
  0xb0   :  { %v328_v44 = vmax.f32 %v312_v35, 0.0  ;;  %v327_v45 = vmax.f32 %v311_v38, 0.0  ;;  %v436_v35 = vld [vmem:[#allocation3 + $0x20] sm:$0xff]  ;;  %v435_v38 = vld [vmem:[#allocation3 + $0x18] sm:$0xff] }
  0xb2   :  { %v360_v49 = vmul.f32 %v656_v47, %v328_v44  ;;  %v359_v50 = vmul.f32 %v655_v22, %v327_v45 }
  0xb3   :  { %387 = vadd.xlane.f32.xlu0 %v361_v29 }
  0xb4   :  { %379 = vadd.xlane.f32.xlu1 %v357_v30  ;;  %377 = vadd.xlane.f32.xlu2 %v356_v31 }
  0xb5   :  { %v281_v32 = vpop.permute.xlu0 %280  ;;  %v286_v52 = vpop.permute.xlu1 %285 }
  0xb6   :  { %v315_v53 = vsub.f32 %v838_v40, %v286_v52  ;;  %v314_v54 = vsub.f32 %v838_v40, %v281_v32 }
  0xb8   :  { %v331_v56 = vmax.f32 %v315_v53, 0.0  ;;  %v330_v57 = vmax.f32 %v314_v54, 0.0 }
  0xba   :  { %v363_v60 = vmul.f32 %v659_v58, %v331_v56  ;;  %v362_v62 = vmul.f32 %v658_v39, %v330_v57  ;;  %v439_v56 = vld [vmem:[#allocation3 + $0x38] sm:$0xff]  ;;  %v438_v57 = vld [vmem:[#allocation3 + $0x30] sm:$0xff] }
  0xbb   :  { %470 = vadd.xlane.f32.xlu0 %v658_v39 }
  0xbc   :  { %462 = vadd.xlane.f32.xlu1 %v654_v9  ;;  %460 = vadd.xlane.f32.xlu2 %v653_v28 }
  0xbd   :  { %v140_v43 = vpop.permute.xlu0 %139  ;;  %v296_v59 = vpop.permute.xlu1 %295 }
  0xbe   :  { %vm168_vm12 = vcmp.eq.f32.partialorder %v140_v43, %v832_v37  ;;  %v317_v63 = vsub.f32 %v838_v40, %v296_v59 }
  0xbf   :  { %v660_v46 = vsel %vm168_vm12, 1.0, %v702_v42 }
  0xc0   :  { %v364_v48 = vmul.f32 %v660_v46, %v332_v36  ;;  %v333_v2 = vmax.f32 %v317_v63, 0.0 }
  0xc2   :  { %v365_v5 = vmul.f32 %v661_v55, %v333_v2  ;;  %v344_v2 = vld [vmem:[#allocation2 + $0x48] sm:$0xff] }
  0xc3   :  { %393 = vadd.xlane.f32.xlu0 %v364_v48  ;;  %v340_v48 = vld [vmem:[#allocation2 + $0x28] sm:$0xff] }
  0xc4   :  { %385 = vadd.xlane.f32.xlu1 %v360_v49  ;;  %383 = vadd.xlane.f32.xlu2 %v359_v50 }
  0xc5   :  { %v301_v61 = vpop.permute.xlu0 %300  ;;  %v150_v1 = vpop.permute.xlu1 %149 }
  0xc6   :  { %v318_v0 = vsub.f32 %v838_v40, %v301_v61  ;;  %vm170_vm0 = vcmp.eq.f32.partialorder %v150_v1, %v832_v37  ;;  %v432_v37 = vld [vmem:[#allocation3] sm:$0xff] }
  0xc7   :  { %v662_v40 = vsel %vm170_vm0, 1.0, %v702_v42  ;;  %v339_v42 = vld [vmem:[#allocation2 + $0x20] sm:$0xff] }
  0xc8   :  { %v334_v3 = vmax.f32 %v318_v0, 0.0  ;;  %v348_v0 = vld [vmem:[#allocation2 + $0x68] sm:$0xff] }
  0xca   :  { %v366_v4 = vmul.f32 %v662_v40, %v334_v3  ;;  %v343_v3 = vld [vmem:[#allocation2 + $0x40] sm:$0xff] }
  0xcb   :  { %476 = vadd.xlane.f32.xlu0 %v661_v55  ;;  %v443_v55 = vld [vmem:[#allocation3 + $0x58] sm:$0xff] }
  0xcc   :  { %468 = vadd.xlane.f32.xlu1 %v657_v27  ;;  %466 = vadd.xlane.f32.xlu2 %v656_v47  ;;  %v337_v27 = vld [vmem:[#allocation2 + $0x10] sm:$0xff] }
  0xcd   :  { %v341_v47 = vld [vmem:[#allocation2 + $0x30] sm:$0xff] }
  0xd4   :  { %391 = vadd.xlane.f32.xlu1 %v363_v60  ;;  %389 = vadd.xlane.f32.xlu2 %v362_v62 }
  0xdc   :  { %474 = vadd.xlane.f32.xlu1 %v660_v46  ;;  %472 = vadd.xlane.f32.xlu2 %v659_v58  ;;  %v345_v46 = vld [vmem:[#allocation2 + $0x50] sm:$0xff] }
  0xe4   :  { %397 = vadd.xlane.f32.xlu1 %v366_v4  ;;  %395 = vadd.xlane.f32.xlu2 %v365_v5 }
  0xec   :  { %478 = vadd.xlane.f32.xlu2 %v662_v40 }
  0xf0   :  { %v449_v6 = vpop.xlane.xlu1 %448 }
  0xf1   :  { %v480_v7 = vadd.f32 %v449_v6, %v432_v37 }
  0xf3   :  { %496 = vst.msk [vmem:[#allocation3] sm:$0xff] %vm22_vm14, %v480_v7  ;;  %v451_v9 = vpop.xlane.xlu2 %450 }
  0xf4   :  { %v481_v10 = vadd.f32 %v451_v9, %v433_v8 }
  0xf6   :  { %497 = vst.msk [vmem:[#allocation3 + $0x8] sm:$0xff] %vm22_vm14, %v481_v10  ;;  %v370_v12 = vpop.xlane.xlu0 %369 }
  0xf7   :  { %v400_v13 = vadd.f32 %v370_v12, %v336_v11 }
  0xf9   :  { %417 = vst.msk [vmem:[#allocation2 + $0x8] sm:$0xff] %vm22_vm14, %v400_v13 }
  0xfd   :  { %v574_v13 = vld [vmem:[#allocation3 + $0x8] sm:$0xff] }
  0xfe   :  { %v453_v15 = vpop.xlane.xlu0 %452 }
  0xff   :  { %v482_v16 = vadd.f32 %v453_v15, %v434_v14  ;;  %v573_v15 = vld [vmem:[#allocation3] sm:$0xff] }
 0x100   :  { %v516_v4 = vld [vmem:[#allocation2 + $0x8] sm:$0xff] }
 0x101   :  { %498 = vst.msk [vmem:[#allocation3 + $0x10] sm:$0xff] %vm22_vm14, %v482_v16  ;;  %v532_v11 = vsel %vm22_vm14, %v516_v4, 0.0 }
 0x106   :  { %v376_v17 = vpop.xlane.xlu0 %375 }
 0x107   :  { %v403_v18 = vadd.f32 %v376_v17, %v339_v42  ;;  %v446_v42 = vld [vmem:[#allocation3 + $0x70] sm:$0xff] }
 0x108   :  { %v575_v16 = vld [vmem:[#allocation3 + $0x10] sm:$0xff] }
 0x109   :  { %420 = vst.msk [vmem:[#allocation2 + $0x20] sm:$0xff] %vm22_vm14, %v403_v18 }
 0x10e   :  { %v459_v21 = vpop.xlane.xlu0 %458 }
 0x10f   :  { %v485_v22 = vadd.f32 %v459_v21, %v437_v19  ;;  %v368_v23 = vpop.xlane.xlu2 %367  ;;  %v590_v19 = vsel %vm22_vm14, %v574_v13, 0.0  ;;  %v441_v21 = vld [vmem:[#allocation3 + $0x48] sm:$0xff] }
 0x110   :  { %v399_v24 = vadd.f32 %v368_v23, %v335_v20  ;;  %v442_v20 = vld [vmem:[#allocation3 + $0x50] sm:$0xff] }
 0x111   :  { %501 = vst.msk [vmem:[#allocation3 + $0x28] sm:$0xff] %vm22_vm14, %v485_v22 }
 0x112   :  { %416 = vst.msk [vmem:[#allocation2] sm:$0xff] %vm22_vm14, %v399_v24  ;;  %v589_v24 = vsel %vm22_vm14, %v573_v15, 0.0 }
 0x116   :  { %v382_v28 = vpop.xlane.xlu0 %381 }
 0x117   :  { %v406_v29 = vadd.f32 %v382_v28, %v342_v25  ;;  %v374_v30 = vpop.xlane.xlu1 %373  ;;  %v372_v31 = vpop.xlane.xlu2 %371  ;;  %v592_v25 = vsel %vm22_vm14, %v575_v16, 0.0 }
 0x118   :  { %v402_v32 = vadd.f32 %v374_v30, %v338_v26  ;;  %v401_v33 = vadd.f32 %v372_v31, %v337_v27  ;;  %v591_v30 = vadd.f32 %v590_v19, %v589_v24 }
 0x119   :  { %423 = vst.msk [vmem:[#allocation2 + $0x38] sm:$0xff] %vm22_vm14, %v406_v29  ;;  %v515_v1 = vld [vmem:[#allocation2] sm:$0xff] }
 0x11a   :  { %419 = vst.msk [vmem:[#allocation2 + $0x18] sm:$0xff] %vm22_vm14, %v402_v32  ;;  %v531_v8 = vsel %vm22_vm14, %v515_v1, 0.0  ;;  %v445_v1 = vld [vmem:[#allocation3 + $0x68] sm:$0xff] }
 0x11b   :  { %418 = vst.msk [vmem:[#allocation2 + $0x10] sm:$0xff] %vm22_vm14, %v401_v33  ;;  %v533_v14 = vadd.f32 %v532_v11, %v531_v8  ;;  %v519_v33 = vld [vmem:[#allocation2 + $0x20] sm:$0xff] }
 0x11e   :  { %v465_v39 = vpop.xlane.xlu0 %464 }
 0x11f   :  { %v488_v41 = vadd.f32 %v465_v39, %v440_v34  ;;  %v457_v43 = vpop.xlane.xlu1 %456  ;;  %v455_v44 = vpop.xlane.xlu2 %454  ;;  %v593_v39 = vadd.f32 %v592_v25, %v591_v30 }
 0x120   :  { %v484_v45 = vadd.f32 %v457_v43, %v436_v35  ;;  %v483_v36 = vadd.f32 %v455_v44, %v435_v38 }
 0x121   :  { %504 = vst.msk [vmem:[#allocation3 + $0x40] sm:$0xff] %vm22_vm14, %v488_v41  ;;  %v518_v17 = vld [vmem:[#allocation2 + $0x18] sm:$0xff]  ;;  %v538_v41 = vsel %vm22_vm14, %v519_v33, 0.0 }
 0x122   :  { %500 = vst.msk [vmem:[#allocation3 + $0x20] sm:$0xff] %vm22_vm14, %v484_v45  ;;  %v517_v5 = vld [vmem:[#allocation2 + $0x10] sm:$0xff]  ;;  %v536_v29 = vsel %vm22_vm14, %v518_v17, 0.0 }
 0x123   :  { %499 = vst.msk [vmem:[#allocation3 + $0x18] sm:$0xff] %vm22_vm14, %v483_v36  ;;  %v534_v12 = vsel %vm22_vm14, %v517_v5, 0.0 }
 0x124   :  { %v535_v18 = vadd.f32 %v534_v12, %v533_v14 }
 0x126   :  { %v388_v49 = vpop.xlane.xlu0 %387  ;;  %v537_v35 = vadd.f32 %v536_v29, %v535_v18 }
 0x127   :  { %v409_v50 = vadd.f32 %v388_v49, %v345_v46  ;;  %v380_v51 = vpop.xlane.xlu1 %379  ;;  %v378_v52 = vpop.xlane.xlu2 %377  ;;  %v347_v46 = vld [vmem:[#allocation2 + $0x60] sm:$0xff] }
 0x128   :  { %v405_v53 = vadd.f32 %v380_v51, %v341_v47  ;;  %v404_v54 = vadd.f32 %v378_v52, %v340_v48  ;;  %v539_v36 = vadd.f32 %v538_v41, %v537_v35  ;;  %v346_v47 = vld [vmem:[#allocation2 + $0x58] sm:$0xff]  ;;  %v581_v13 = vld [vmem:[#allocation3 + $0x40] sm:$0xff] }
 0x129   :  { %426 = vst.msk [vmem:[#allocation2 + $0x50] sm:$0xff] %vm22_vm14, %v409_v50  ;;  %v577_v44 = vld [vmem:[#allocation3 + $0x20] sm:$0xff]  ;;  %v604_v19 = vsel %vm22_vm14, %v581_v13, 0.0 }
 0x12a   :  { %422 = vst.msk [vmem:[#allocation2 + $0x30] sm:$0xff] %vm22_vm14, %v405_v53  ;;  %v576_v22 = vld [vmem:[#allocation3 + $0x18] sm:$0xff]  ;;  %v596_v50 = vsel %vm22_vm14, %v577_v44, 0.0  ;;  %v578_v53 = vld [vmem:[#allocation3 + $0x28] sm:$0xff] }
 0x12b   :  { %421 = vst.msk [vmem:[#allocation2 + $0x28] sm:$0xff] %vm22_vm14, %v404_v54  ;;  %v594_v38 = vsel %vm22_vm14, %v576_v22, 0.0  ;;  %v349_v22 = vld [vmem:[#allocation2 + $0x70] sm:$0xff] }
 0x12c   :  { %v595_v45 = vadd.f32 %v594_v38, %v593_v39 }
 0x12e   :  { %v471_v58 = vpop.xlane.xlu0 %470 }
 0x12f   :  { %v491_v59 = vadd.f32 %v471_v58, %v443_v55  ;;  %v463_v60 = vpop.xlane.xlu1 %462  ;;  %v461_v62 = vpop.xlane.xlu2 %460  ;;  %v597_v55 = vadd.f32 %v596_v50, %v595_v45 }
 0x130   :  { %v487_v61 = vadd.f32 %v463_v60, %v439_v56  ;;  %v486_v63 = vadd.f32 %v461_v62, %v438_v57 }
 0x131   :  { %507 = vst.msk [vmem:[#allocation3 + $0x58] sm:$0xff] %vm22_vm14, %v491_v59  ;;  %v521_v48 = vld [vmem:[#allocation2 + $0x30] sm:$0xff]  ;;  %v522_v59 = vld [vmem:[#allocation2 + $0x38] sm:$0xff] }
 0x132   :  { %503 = vst.msk [vmem:[#allocation3 + $0x38] sm:$0xff] %vm22_vm14, %v487_v61  ;;  %v520_v34 = vld [vmem:[#allocation2 + $0x28] sm:$0xff]  ;;  %v542_v58 = vsel %vm22_vm14, %v521_v48, 0.0  ;;  %v598_v61 = vsel %vm22_vm14, %v578_v53, 0.0 }
 0x133   :  { %502 = vst.msk [vmem:[#allocation3 + $0x30] sm:$0xff] %vm22_vm14, %v486_v63  ;;  %v540_v43 = vsel %vm22_vm14, %v520_v34, 0.0 }
 0x134   :  { %v541_v49 = vadd.f32 %v540_v43, %v539_v36  ;;  %v447_v43 = vld [vmem:[#allocation3 + $0x78] sm:$0xff] }
 0x136   :  { %v394_v40 = vpop.xlane.xlu0 %393  ;;  %v543_v62 = vadd.f32 %v542_v58, %v541_v49 }
 0x137   :  { %v412_v37 = vadd.f32 %v394_v40, %v348_v0  ;;  %v386_v6 = vpop.xlane.xlu1 %385  ;;  %v384_v7 = vpop.xlane.xlu2 %383  ;;  %v599_v0 = vadd.f32 %v598_v61, %v597_v55 }
 0x138   :  { %v408_v9 = vadd.f32 %v386_v6, %v344_v2  ;;  %v407_v10 = vadd.f32 %v384_v7, %v343_v3  ;;  %v444_v2 = vld [vmem:[#allocation3 + $0x60] sm:$0xff]  ;;  %v544_v3 = vsel %vm22_vm14, %v522_v59, 0.0  ;;  %v584_v38 = vld [vmem:[#allocation3 + $0x58] sm:$0xff] }
 0x139   :  { %429 = vst.msk [vmem:[#allocation2 + $0x68] sm:$0xff] %vm22_vm14, %v412_v37  ;;  %v580_v4 = vld [vmem:[#allocation3 + $0x38] sm:$0xff]  ;;  %v545_v37 = vadd.f32 %v544_v3, %v543_v62 }
 0x13a   :  { %425 = vst.msk [vmem:[#allocation2 + $0x48] sm:$0xff] %vm22_vm14, %v408_v9  ;;  %v579_v54 = vld [vmem:[#allocation3 + $0x30] sm:$0xff]  ;;  %v602_v12 = vsel %vm22_vm14, %v580_v4, 0.0 }
 0x13b   :  { %424 = vst.msk [vmem:[#allocation2 + $0x40] sm:$0xff] %vm22_vm14, %v407_v10  ;;  %v600_v63 = vsel %vm22_vm14, %v579_v54, 0.0 }
 0x13c   :  { %v601_v5 = vadd.f32 %v600_v63, %v599_v0 }
 0x13e   :  { %v477_v23 = vpop.xlane.xlu0 %476  ;;  %v603_v15 = vadd.f32 %v602_v12, %v601_v5 }
 0x13f   :  { %v494_v26 = vadd.f32 %v477_v23, %v446_v42  ;;  %v469_v27 = vpop.xlane.xlu1 %468  ;;  %v467_v28 = vpop.xlane.xlu2 %466  ;;  %v525_v42 = vld [vmem:[#allocation2 + $0x50] sm:$0xff] }
 0x140   :  { %v490_v31 = vadd.f32 %v469_v27, %v442_v20  ;;  %v489_v32 = vadd.f32 %v467_v28, %v441_v21  ;;  %v350_v21 = vld [vmem:[#allocation2 + $0x78] sm:$0xff]  ;;  %v605_v23 = vadd.f32 %v604_v19, %v603_v15  ;;  %v528_v45 = vld [vmem:[#allocation2 + $0x68] sm:$0xff] }
 0x141   :  { %510 = vst.msk [vmem:[#allocation3 + $0x70] sm:$0xff] %vm22_vm14, %v494_v26  ;;  %v524_v10 = vld [vmem:[#allocation2 + $0x48] sm:$0xff]  ;;  %v550_v26 = vsel %vm22_vm14, %v525_v42, 0.0 }
 0x142   :  { %506 = vst.msk [vmem:[#allocation3 + $0x50] sm:$0xff] %vm22_vm14, %v490_v31  ;;  %v523_v60 = vld [vmem:[#allocation2 + $0x40] sm:$0xff]  ;;  %v548_v16 = vsel %vm22_vm14, %v524_v10, 0.0 }
 0x143   :  { %505 = vst.msk [vmem:[#allocation3 + $0x48] sm:$0xff] %vm22_vm14, %v489_v32  ;;  %v546_v40 = vsel %vm22_vm14, %v523_v60, 0.0 }
 0x144   :  { %v547_v11 = vadd.f32 %v546_v40, %v545_v37 }
 0x146   :  { %v549_v18 = vadd.f32 %v548_v16, %v547_v11 }
 0x147   :  { %v392_v51 = vpop.xlane.xlu1 %391  ;;  %v390_v52 = vpop.xlane.xlu2 %389 }
 0x148   :  { %v411_v56 = vadd.f32 %v392_v51, %v347_v46  ;;  %v410_v57 = vadd.f32 %v390_v52, %v346_v47  ;;  %v551_v32 = vadd.f32 %v550_v26, %v549_v18  ;;  %v610_v46 = vsel %vm22_vm14, %v584_v38, 0.0  ;;  %v587_v62 = vld [vmem:[#allocation3 + $0x70] sm:$0xff] }
 0x149   :  { %v583_v28 = vld [vmem:[#allocation3 + $0x50] sm:$0xff]  ;;  %v556_v51 = vsel %vm22_vm14, %v528_v45, 0.0  ;;  %v616_v0 = vsel %vm22_vm14, %v587_v62, 0.0 }
 0x14a   :  { %428 = vst.msk [vmem:[#allocation2 + $0x60] sm:$0xff] %vm22_vm14, %v411_v56  ;;  %v582_v14 = vld [vmem:[#allocation3 + $0x48] sm:$0xff]  ;;  %v608_v35 = vsel %vm22_vm14, %v583_v28, 0.0 }
 0x14b   :  { %427 = vst.msk [vmem:[#allocation2 + $0x58] sm:$0xff] %vm22_vm14, %v410_v57  ;;  %v606_v20 = vsel %vm22_vm14, %v582_v14, 0.0 }
 0x14c   :  { %v607_v29 = vadd.f32 %v606_v20, %v605_v23 }
 0x14e   :  { %v609_v41 = vadd.f32 %v608_v35, %v607_v29 }
 0x14f   :  { %v475_v6 = vpop.xlane.xlu1 %474  ;;  %v473_v7 = vpop.xlane.xlu2 %472 }
 0x150   :  { %v493_v8 = vadd.f32 %v475_v6, %v445_v1  ;;  %v492_v9 = vadd.f32 %v473_v7, %v444_v2  ;;  %v611_v49 = vadd.f32 %v610_v46, %v609_v41 }
 0x151   :  { %v527_v33 = vld [vmem:[#allocation2 + $0x60] sm:$0xff] }
 0x152   :  { %509 = vst.msk [vmem:[#allocation3 + $0x68] sm:$0xff] %vm22_vm14, %v493_v8  ;;  %v526_v17 = vld [vmem:[#allocation2 + $0x58] sm:$0xff]  ;;  %v554_v44 = vsel %vm22_vm14, %v527_v33, 0.0 }
 0x153   :  { %508 = vst.msk [vmem:[#allocation3 + $0x60] sm:$0xff] %vm22_vm14, %v492_v9  ;;  %v552_v27 = vsel %vm22_vm14, %v526_v17, 0.0 }
 0x154   :  { %v553_v34 = vadd.f32 %v552_v27, %v551_v32 }
 0x156   :  { %v555_v36 = vadd.f32 %v554_v44, %v553_v34 }
 0x157   :  { %v398_v24 = vpop.xlane.xlu1 %397  ;;  %v396_v25 = vpop.xlane.xlu2 %395 }
 0x158   :  { %v414_v30 = vadd.f32 %v398_v24, %v350_v21  ;;  %v413_v31 = vadd.f32 %v396_v25, %v349_v22  ;;  %v557_v56 = vadd.f32 %v556_v51, %v555_v36 }
 0x159   :  { %v586_v52 = vld [vmem:[#allocation3 + $0x68] sm:$0xff] }
 0x15a   :  { %431 = vst.msk [vmem:[#allocation2 + $0x78] sm:$0xff] %vm22_vm14, %v414_v30  ;;  %v585_v39 = vld [vmem:[#allocation3 + $0x60] sm:$0xff]  ;;  %v614_v59 = vsel %vm22_vm14, %v586_v52, 0.0 }
 0x15b   :  { %430 = vst.msk [vmem:[#allocation2 + $0x70] sm:$0xff] %vm22_vm14, %v413_v31  ;;  %v612_v47 = vsel %vm22_vm14, %v585_v39, 0.0 }
 0x15c   :  { %v613_v53 = vadd.f32 %v612_v47, %v611_v49 }
 0x15e   :  { %v615_v61 = vadd.f32 %v614_v59, %v613_v53 }
 0x15f   :  { %v479_v48 = vpop.xlane.xlu2 %478 }
 0x160   :  { %v495_v50 = vadd.f32 %v479_v48, %v447_v43  ;;  %v617_v2 = vadd.f32 %v616_v0, %v615_v61 }
 0x161   :  { %v530_v55 = vld [vmem:[#allocation2 + $0x78] sm:$0xff] }
 0x162   :  { %511 = vst.msk [vmem:[#allocation3 + $0x78] sm:$0xff] %vm22_vm14, %v495_v50  ;;  %v529_v54 = vld [vmem:[#allocation2 + $0x70] sm:$0xff]  ;;  %v560_v60 = vsel %vm22_vm14, %v530_v55, 0.0 }
 0x163   :  { %v558_v57 = vsel %vm22_vm14, %v529_v54, 0.0 }
 0x164   :  { %v559_v58 = vadd.f32 %v558_v57, %v557_v56 }
 0x166   :  { %v561_v63 = vadd.f32 %v560_v60, %v559_v58 }
 0x168   :  { %562 = vadd.xlane.f32.xlu0 %v561_v63 }
 0x169   :  { %v588_v1 = vld [vmem:[#allocation3 + $0x78] sm:$0xff] }
 0x16a   :  { %v618_v3 = vsel %vm22_vm14, %v588_v1, 0.0 }
 0x16b   :  { %v619_v40 = vadd.f32 %v618_v3, %v617_v2 }
 0x16d   :  { %620 = vadd.xlane.f32.xlu1 %v619_v40 }
 0x1db   :  { %v563_v4 = vpop.xlane.xlu0 %562 }
 0x1dc   :  { %v564_v5 = vrot.slane %v563_v4, 4 }
 0x1de   :  { %v565_v37 = vadd.f32 %v564_v5, %v563_v4 }
 0x1e0   :  { %v566_v6 = vrot.slane %v565_v37, 2  ;;  %v621_v7 = vpop.xlane.xlu1 %620 }
 0x1e1   :  { %v622_v8 = vrot.slane %v621_v7, 4 }
 0x1e2   :  { %v567_v9 = vadd.f32 %v566_v6, %v565_v37 }
 0x1e3   :  { %v623_v10 = vadd.f32 %v622_v8, %v621_v7 }
 0x1e4   :  { %v568_v11 = vrot.slane %v567_v9, 1 }
 0x1e5   :  { %v624_v12 = vrot.slane %v623_v10, 2 }
 0x1e6   :  { %v569_v13 = vadd.f32 %v568_v11, %v567_v9 }
 0x1e7   :  { %v625_v14 = vadd.f32 %v624_v12, %v623_v10 }
 0x1e8   :  { %663 = vpush %v569_v13 }
 0x1e9   :  { %v626_v15 = vrot.slane %v625_v14, 1 }
 0x1eb   :  { %v627_v16 = vadd.f32 %v626_v15, %v625_v14 }
 0x1ed   :  { %665 = vpush %v627_v16 }
 0x219   :  { %s664_s0 = spop %663 }
 0x21a   :  { %v571_v42 = vstv %s664_s0 }
 0x21b   :  { %572 = vst [vmem:[#allocation4] sm:$0x1] %v571_v42 }
 0x21e   :  { %s666_s7 = spop %665 }
 0x21f   :  { %v629_v17 = vstv %s666_s7 }
 0x220   :  { %630 = vst [vmem:[#allocation4 + $0x1] sm:$0x1] %v629_v17 }
 0x221   :  { %641 = dma.vmem_to_hbm [thread:$0]  %s637_s3, 32, %s639_s6, [#allocation5]  }
 0x222   :  { %699 = dma.done.wait [#allocation5], 32  }
 0x223   :  { %700 = vsyncadd [#allocation5], 4294967264 }
 0x224   :  { %646 = vsyncpa [#allocation5], 1 }

</bundles_post_ra>
